<compile_context>
chip_gen: v7x
topology: tpu7x:2x2x1
jax: 0.10.0
libtpu: 0.0.40
codegen_flags: <defaults>
</compile_context>

<pallas_src>
import functools

import jax
import jax.numpy as jnp
from jax.experimental import pallas as pl
from jax.experimental.pallas import tpu as pltpu

EPS = 1e-8            # torch.nn.CosineSimilarity default eps
EPS2 = EPS * EPS      # clamp applied to the squared norms (== clamping each norm)


def _utility_kernel(scales,
                    vox_ref, feat_ref, det_ref, xbev_ref,
                    wv_ref, bv_ref, wf_ref, bf_ref, wd_ref, bd_ref,
                    wx_ref, bx_ref,
                    out_ref):
    """Per-tile hot path.

    Refs (T = tile_hw pixels on the lane axis):
      vox/feat/det/xbev : (C_g, T)  channel planes (input dtype, e.g. bf16)
      w*                : (E, C_g)  linear weights (PyTorch (out,in) layout)
      b*                : (E, 1)    linear biases, f32
      out               : (G, T)    utility rows, f32
    """
    # Full-info embedding, shared by all granularities: (E, T), f32 accum.
    e_full = jnp.dot(wx_ref[...], xbev_ref[...],
                     preferred_element_type=jnp.float32) + bx_ref[...]
    ss_full = jnp.maximum(
        jnp.sum(e_full * e_full, axis=0, keepdims=True), EPS2)          # (1, T)

    singles = ((vox_ref, wv_ref, bv_ref),
               (feat_ref, wf_ref, bf_ref),
               (det_ref, wd_ref, bd_ref))

    for g_idx, (x_ref, w_ref, b_ref) in enumerate(singles):
        e_g = jnp.dot(w_ref[...], x_ref[...],
                      preferred_element_type=jnp.float32) + b_ref[...]  # (E, T)
        dot = jnp.sum(e_g * e_full, axis=0, keepdims=True)              # (1, T)
        ss_g = jnp.maximum(
            jnp.sum(e_g * e_g, axis=0, keepdims=True), EPS2)            # (1, T)
        # cos = dot / (max(||g||,eps) * max(||full||,eps))  via a single rsqrt
        similarity = dot * jax.lax.rsqrt(ss_g * ss_full)
        # (sim + 1) / 2 / bw  ==  sim * (0.5/bw) + (0.5/bw)
        s = scales[g_idx]
        out_ref[g_idx:g_idx + 1, :] = (similarity * s + s).astype(out_ref.dtype)


def _pick_tile(hw, max_tile=2048):
    """Largest pixel tile <= max_tile that divides HW and keeps lanes dense."""
    if hw <= max_tile:
        return hw
    for t in range(max_tile - (max_tile % 128), 0, -128):
        if hw % t == 0:
            return t
    return hw  # fall back to one tile per batch element


def target_utility_calculator(F_vox_bev, F_feat_bev, F_det_bev, X_bev,
                              params, bandwidth_costs, *, tile_hw=None):
    """Matches TargetUtilityCalculator.forward.

    Inputs are NCHW (like PyTorch), any float dtype (bf16 recommended).
    Returns (B, H, W, G) in X_bev.dtype.
    """
    B, _, H, W = X_bev.shape
    HW = H * W
    G = 3
    E = params["wx"].shape[0]

    if tile_hw is None:
        tile_hw = _pick_tile(HW)
    assert HW % tile_hw == 0
    assert tile_hw == HW or tile_hw % 128 == 0

    # Free reshapes -- no transpose, no dtype change, no extra HBM traffic.
    def planes(x):
        return x.reshape(x.shape[0], x.shape[1], HW)

    vox, feat, det, xbev = (planes(F_vox_bev), planes(F_feat_bev),
                            planes(F_det_bev), planes(X_bev))
    in_dtype = X_bev.dtype

    # Weights are tiny: cast them to the feature dtype (native bf16 MXU path).
    # Biases stay f32 -- they are added after the f32 accumulation.
    def w(name):
        return params[name].astype(in_dtype)

    def b(name):
        return params[name].astype(jnp.float32)

    c_vox, c_feat, c_det, c_full = (vox.shape[1], feat.shape[1],
                                    det.shape[1], xbev.shape[1])

    scales = tuple(float(0.5 / c) for c in bandwidth_costs)
    kernel = functools.partial(_utility_kernel, scales)

    def feat_spec(c):
        return pl.BlockSpec((None, c, tile_hw), lambda bi, ti: (bi, 0, ti))

    def const_spec(shape):
        # Constant index_map -> weights/biases stay VMEM-resident across grid.
        return pl.BlockSpec(shape, lambda bi, ti: (0, 0))

    out = pl.pallas_call(
        kernel,
        out_shape=jax.ShapeDtypeStruct((B, G, HW), jnp.float32),
        grid_spec=pltpu.PrefetchScalarGridSpec(
            num_scalar_prefetch=0,
            grid=(B, HW // tile_hw),
            in_specs=[
                feat_spec(c_vox), feat_spec(c_feat), feat_spec(c_det),
                feat_spec(c_full),
                const_spec((E, c_vox)), const_spec((E, 1)),
                const_spec((E, c_feat)), const_spec((E, 1)),
                const_spec((E, c_det)), const_spec((E, 1)),
                const_spec((E, c_full)), const_spec((E, 1)),
            ],
            out_specs=pl.BlockSpec((None, G, tile_hw),
                                   lambda bi, ti: (bi, 0, ti)),
        ),
        compiler_params=pltpu.CompilerParams(
            dimension_semantics=("parallel", "parallel")),
    )(vox, feat, det, xbev,
      w("wv"), b("bv"), w("wf"), b("bf"),
      w("wd"), b("bd"), w("wx"), b("bx"))

    # (B, G, HW) -> (B, H, W, G); the output is tiny (G = 3 channels).
    out = jnp.transpose(out.reshape(B, G, H, W), (0, 2, 3, 1))
    return out.astype(in_dtype)


def make_params(key, single_channels, full_channels, embedding_dim):
    """Synthetic weights in PyTorch nn.Linear layout: W (E, C_in), b (E, 1)."""
    keys = jax.random.split(key, 8)
    c_v, c_f, c_d = single_channels

    def lin(kw, kb, c_in):
        bound = 1.0 / jnp.sqrt(jnp.float32(c_in))
        wgt = jax.random.uniform(kw, (embedding_dim, c_in), jnp.float32,
                                 -bound, bound)
        bias = jax.random.uniform(kb, (embedding_dim, 1), jnp.float32,
                                  -bound, bound)
        return wgt, bias

    wv, bv = lin(keys[0], keys[1], c_v)
    wf, bf = lin(keys[2], keys[3], c_f)
    wd, bd = lin(keys[4], keys[5], c_d)
    wx, bx = lin(keys[6], keys[7], full_channels)
    return {"wv": wv, "bv": bv, "wf": wf, "bf": bf,
            "wd": wd, "bd": bd, "wx": wx, "bx": bx}


def reference(F_vox_bev, F_feat_bev, F_det_bev, X_bev, params, bandwidth_costs):
    """Pure-JAX reference following the same dtype path as the kernel."""
    def embed(x, wgt, bias):
        x_p = jnp.transpose(x, (0, 2, 3, 1))                      # (B,H,W,C)
        e = jnp.einsum("bhwc,ec->bhwe", x_p, wgt.astype(x.dtype),
                       preferred_element_type=jnp.float32)
        return e + bias[:, 0].astype(jnp.float32)

    e_full = embed(X_bev, params["wx"], params["bx"])
    ss_full = jnp.maximum(jnp.sum(e_full * e_full, -1), EPS2)
    outs = []
    for w_name, b_name, bw, x in (("wv", "bv", bandwidth_costs[0], F_vox_bev),
                                  ("wf", "bf", bandwidth_costs[1], F_feat_bev),
                                  ("wd", "bd", bandwidth_costs[2], F_det_bev)):
        e_g = embed(x, params[w_name], params[b_name])
        dot = jnp.sum(e_g * e_full, -1)
        ss_g = jnp.maximum(jnp.sum(e_g * e_g, -1), EPS2)
        sim = dot * jax.lax.rsqrt(ss_g * ss_full)
        outs.append((sim + 1.0) * 0.5 / bw)
    return jnp.stack(outs, axis=-1)


if __name__ == "__main__":
    key = jax.random.PRNGKey(0)
    k_v, k_f, k_d, k_x, k_p = jax.random.split(key, 5)

    B, H, W = 2, 16, 16
    C_vox, C_feat, C_det = 8, 16, 4
    C_full = 32
    E = 64
    bandwidth_costs = [10.0, 5.0, 2.0]

    dt = jnp.bfloat16   # keep HBM traffic narrow; kernel accumulates in f32
    F_vox_bev = jax.random.normal(k_v, (B, C_vox, H, W), dt)
    F_feat_bev = jax.random.normal(k_f, (B, C_feat, H, W), dt)
    F_det_bev = jax.random.normal(k_d, (B, C_det, H, W), dt)
    X_bev = jax.random.normal(k_x, (B, C_full, H, W), dt)

    params = make_params(k_p, [C_vox, C_feat, C_det], C_full, E)

    out = target_utility_calculator(F_vox_bev, F_feat_bev, F_det_bev, X_bev,
                                    params, bandwidth_costs)
    out = jax.block_until_ready(out)
    assert out.shape == (B, H, W, 3)

    ref = reference(F_vox_bev, F_feat_bev, F_det_bev, X_bev,
                    params, bandwidth_costs)
    err = float(jnp.max(jnp.abs(out.astype(jnp.float32) - ref)))
    assert jnp.allclose(out.astype(jnp.float32), ref, atol=2e-2, rtol=2e-2), err

    print("KERNEL_OK")
</pallas_src>

<mosaic_0001>
module attributes {stable_mosaic.version = 11 : i64} {
  func.func @_utility_kernel(%arg0: i32, %arg1: i32, %arg2: memref<1x8x256xbf16, #tpu.memory_space<vmem>>, %arg3: memref<1x16x256xbf16, #tpu.memory_space<vmem>>, %arg4: memref<1x4x256xbf16, #tpu.memory_space<vmem>>, %arg5: memref<1x32x256xbf16, #tpu.memory_space<vmem>>, %arg6: memref<64x8xbf16, #tpu.memory_space<vmem>>, %arg7: memref<64x1xf32, #tpu.memory_space<vmem>>, %arg8: memref<64x16xbf16, #tpu.memory_space<vmem>>, %arg9: memref<64x1xf32, #tpu.memory_space<vmem>>, %arg10: memref<64x4xbf16, #tpu.memory_space<vmem>>, %arg11: memref<64x1xf32, #tpu.memory_space<vmem>>, %arg12: memref<64x32xbf16, #tpu.memory_space<vmem>>, %arg13: memref<64x1xf32, #tpu.memory_space<vmem>>, %arg14: memref<1x3x256xf32, #tpu.memory_space<vmem>>) attributes {dimension_semantics = [#tpu.dimension_semantics<parallel>, #tpu.dimension_semantics<parallel>], iteration_bounds = array<i64: 2, 1>, scalar_prefetch = 0 : i64, scratch_operands = 0 : i64, tpu.core_type = #tpu.core_type<tc>, window_params = [{transform_indices = @transform_0, window_bounds = array<i64: 1, 8, 256>}, {transform_indices = @transform_1, window_bounds = array<i64: 1, 16, 256>}, {transform_indices = @transform_2, window_bounds = array<i64: 1, 4, 256>}, {transform_indices = @transform_3, window_bounds = array<i64: 1, 32, 256>}, {pipeline_mode = #tpu.pipeline_mode<synchronous>, transform_indices = @transform_4, window_bounds = array<i64: 64, 8>}, {pipeline_mode = #tpu.pipeline_mode<synchronous>, transform_indices = @transform_5, window_bounds = array<i64: 64, 1>}, {pipeline_mode = #tpu.pipeline_mode<synchronous>, transform_indices = @transform_6, window_bounds = array<i64: 64, 16>}, {pipeline_mode = #tpu.pipeline_mode<synchronous>, transform_indices = @transform_7, window_bounds = array<i64: 64, 1>}, {pipeline_mode = #tpu.pipeline_mode<synchronous>, transform_indices = @transform_8, window_bounds = array<i64: 64, 4>}, {pipeline_mode = #tpu.pipeline_mode<synchronous>, transform_indices = @transform_9, window_bounds = array<i64: 64, 1>}, {pipeline_mode = #tpu.pipeline_mode<synchronous>, transform_indices = @transform_10, window_bounds = array<i64: 64, 32>}, {pipeline_mode = #tpu.pipeline_mode<synchronous>, transform_indices = @transform_11, window_bounds = array<i64: 64, 1>}, {transform_indices = @transform_12, window_bounds = array<i64: 1, 3, 256>}]} {
    %c0 = arith.constant 0 : index
    %c0_0 = arith.constant 0 : index
    %0 = vector.load %arg12[%c0, %c0_0] : memref<64x32xbf16, #tpu.memory_space<vmem>>, vector<64x32xbf16>
    %c0_1 = arith.constant 0 : index
    %c0_2 = arith.constant 0 : index
    %c0_3 = arith.constant 0 : index
    %1 = vector.load %arg5[%c0_1, %c0_2, %c0_3] : memref<1x32x256xbf16, #tpu.memory_space<vmem>>, vector<1x32x256xbf16>
    %2 = vector.shape_cast %1 : vector<1x32x256xbf16> to vector<32x256xbf16>
    %cst = arith.constant dense<0.000000e+00> : vector<64x256xf32>
    %3 = tpu.matmul %0, %2, %cst {dimension_numbers = #tpu.dot_dimension_numbers<[1], [0], [0], [1], [0, 0, 1, 1], [], []>} : vector<64x32xbf16>, vector<32x256xbf16>, vector<64x256xf32> -> vector<64x256xf32>
    %c0_4 = arith.constant 0 : index
    %c0_5 = arith.constant 0 : index
    %4 = vector.load %arg13[%c0_4, %c0_5] : memref<64x1xf32, #tpu.memory_space<vmem>>, vector<64x1xf32>
    %5 = vector.broadcast %4 : vector<64x1xf32> to vector<64x256xf32>
    %6 = arith.addf %3, %5 : vector<64x256xf32>
    %7 = arith.mulf %6, %6 : vector<64x256xf32>
    %cst_6 = arith.constant dense<0.000000e+00> : vector<256xf32>
    %8 = vector.multi_reduction <add>, %7, %cst_6 [0] : vector<64x256xf32> to vector<256xf32>
    %9 = vector.shape_cast %8 : vector<256xf32> to vector<1x256xf32>
    %cst_7 = arith.constant 1.000000e-16 : f32
    %10 = vector.broadcast %cst_7 : f32 to vector<1x256xf32>
    %11 = arith.maximumf %9, %10 : vector<1x256xf32>
    %c0_8 = arith.constant 0 : index
    %c0_9 = arith.constant 0 : index
    %12 = vector.load %arg6[%c0_8, %c0_9] : memref<64x8xbf16, #tpu.memory_space<vmem>>, vector<64x8xbf16>
    %c0_10 = arith.constant 0 : index
    %c0_11 = arith.constant 0 : index
    %c0_12 = arith.constant 0 : index
    %13 = vector.load %arg2[%c0_10, %c0_11, %c0_12] : memref<1x8x256xbf16, #tpu.memory_space<vmem>>, vector<1x8x256xbf16>
    %14 = vector.shape_cast %13 : vector<1x8x256xbf16> to vector<8x256xbf16>
    %cst_13 = arith.constant dense<0.000000e+00> : vector<64x256xf32>
    %15 = tpu.matmul %12, %14, %cst_13 {dimension_numbers = #tpu.dot_dimension_numbers<[1], [0], [0], [1], [0, 0, 1, 1], [], []>} : vector<64x8xbf16>, vector<8x256xbf16>, vector<64x256xf32> -> vector<64x256xf32>
    %c0_14 = arith.constant 0 : index
    %c0_15 = arith.constant 0 : index
    %16 = vector.load %arg7[%c0_14, %c0_15] : memref<64x1xf32, #tpu.memory_space<vmem>>, vector<64x1xf32>
    %17 = vector.broadcast %16 : vector<64x1xf32> to vector<64x256xf32>
    %18 = arith.addf %15, %17 : vector<64x256xf32>
    %19 = arith.mulf %18, %6 : vector<64x256xf32>
    %cst_16 = arith.constant dense<0.000000e+00> : vector<256xf32>
    %20 = vector.multi_reduction <add>, %19, %cst_16 [0] : vector<64x256xf32> to vector<256xf32>
    %21 = vector.shape_cast %20 : vector<256xf32> to vector<1x256xf32>
    %22 = arith.mulf %18, %18 : vector<64x256xf32>
    %cst_17 = arith.constant dense<0.000000e+00> : vector<256xf32>
    %23 = vector.multi_reduction <add>, %22, %cst_17 [0] : vector<64x256xf32> to vector<256xf32>
    %24 = vector.shape_cast %23 : vector<256xf32> to vector<1x256xf32>
    %cst_18 = arith.constant 1.000000e-16 : f32
    %25 = vector.broadcast %cst_18 : f32 to vector<1x256xf32>
    %26 = arith.maximumf %24, %25 : vector<1x256xf32>
    %27 = arith.mulf %26, %11 : vector<1x256xf32>
    %28 = math.rsqrt %27 : vector<1x256xf32>
    %29 = arith.mulf %21, %28 : vector<1x256xf32>
    %cst_19 = arith.constant 5.000000e-02 : f32
    %30 = vector.broadcast %cst_19 : f32 to vector<1x256xf32>
    %31 = arith.mulf %29, %30 : vector<1x256xf32>
    %cst_20 = arith.constant 5.000000e-02 : f32
    %32 = vector.broadcast %cst_20 : f32 to vector<1x256xf32>
    %33 = arith.addf %31, %32 : vector<1x256xf32>
    %c0_21 = arith.constant 0 : index
    %c0_22 = arith.constant 0 : index
    %c0_23 = arith.constant 0 : index
    %34 = vector.load %arg14[%c0_21, %c0_22, %c0_23] : memref<1x3x256xf32, #tpu.memory_space<vmem>>, vector<1x1x256xf32>
    %35 = vector.shape_cast %34 : vector<1x1x256xf32> to vector<1x256xf32>
    %36 = vector.shape_cast %33 : vector<1x256xf32> to vector<1x1x256xf32>
    tpu.vector_store %arg14[%c0_21, %c0_22, %c0_23], %36 {strides = array<i32>} : memref<1x3x256xf32, #tpu.memory_space<vmem>>, vector<1x1x256xf32>,
    %c0_24 = arith.constant 0 : index
    %c0_25 = arith.constant 0 : index
    %37 = vector.load %arg8[%c0_24, %c0_25] : memref<64x16xbf16, #tpu.memory_space<vmem>>, vector<64x16xbf16>
    %c0_26 = arith.constant 0 : index
    %c0_27 = arith.constant 0 : index
    %c0_28 = arith.constant 0 : index
    %38 = vector.load %arg3[%c0_26, %c0_27, %c0_28] : memref<1x16x256xbf16, #tpu.memory_space<vmem>>, vector<1x16x256xbf16>
    %39 = vector.shape_cast %38 : vector<1x16x256xbf16> to vector<16x256xbf16>
    %cst_29 = arith.constant dense<0.000000e+00> : vector<64x256xf32>
    %40 = tpu.matmul %37, %39, %cst_29 {dimension_numbers = #tpu.dot_dimension_numbers<[1], [0], [0], [1], [0, 0, 1, 1], [], []>} : vector<64x16xbf16>, vector<16x256xbf16>, vector<64x256xf32> -> vector<64x256xf32>
    %c0_30 = arith.constant 0 : index
    %c0_31 = arith.constant 0 : index
    %41 = vector.load %arg9[%c0_30, %c0_31] : memref<64x1xf32, #tpu.memory_space<vmem>>, vector<64x1xf32>
    %42 = vector.broadcast %41 : vector<64x1xf32> to vector<64x256xf32>
    %43 = arith.addf %40, %42 : vector<64x256xf32>
    %44 = arith.mulf %43, %6 : vector<64x256xf32>
    %cst_32 = arith.constant dense<0.000000e+00> : vector<256xf32>
    %45 = vector.multi_reduction <add>, %44, %cst_32 [0] : vector<64x256xf32> to vector<256xf32>
    %46 = vector.shape_cast %45 : vector<256xf32> to vector<1x256xf32>
    %47 = arith.mulf %43, %43 : vector<64x256xf32>
    %cst_33 = arith.constant dense<0.000000e+00> : vector<256xf32>
    %48 = vector.multi_reduction <add>, %47, %cst_33 [0] : vector<64x256xf32> to vector<256xf32>
    %49 = vector.shape_cast %48 : vector<256xf32> to vector<1x256xf32>
    %cst_34 = arith.constant 1.000000e-16 : f32
    %50 = vector.broadcast %cst_34 : f32 to vector<1x256xf32>
    %51 = arith.maximumf %49, %50 : vector<1x256xf32>
    %52 = arith.mulf %51, %11 : vector<1x256xf32>
    %53 = math.rsqrt %52 : vector<1x256xf32>
    %54 = arith.mulf %46, %53 : vector<1x256xf32>
    %cst_35 = arith.constant 1.000000e-01 : f32
    %55 = vector.broadcast %cst_35 : f32 to vector<1x256xf32>
    %56 = arith.mulf %54, %55 : vector<1x256xf32>
    %cst_36 = arith.constant 1.000000e-01 : f32
    %57 = vector.broadcast %cst_36 : f32 to vector<1x256xf32>
    %58 = arith.addf %56, %57 : vector<1x256xf32>
    %c0_37 = arith.constant 0 : index
    %c1 = arith.constant 1 : index
    %c0_38 = arith.constant 0 : index
    %59 = vector.load %arg14[%c0_37, %c1, %c0_38] : memref<1x3x256xf32, #tpu.memory_space<vmem>>, vector<1x1x256xf32>
    %60 = vector.shape_cast %59 : vector<1x1x256xf32> to vector<1x256xf32>
    %61 = vector.shape_cast %58 : vector<1x256xf32> to vector<1x1x256xf32>
    tpu.vector_store %arg14[%c0_37, %c1, %c0_38], %61 {strides = array<i32>} : memref<1x3x256xf32, #tpu.memory_space<vmem>>, vector<1x1x256xf32>,
    %c0_39 = arith.constant 0 : index
    %c0_40 = arith.constant 0 : index
    %62 = vector.load %arg10[%c0_39, %c0_40] : memref<64x4xbf16, #tpu.memory_space<vmem>>, vector<64x4xbf16>
    %c0_41 = arith.constant 0 : index
    %c0_42 = arith.constant 0 : index
    %c0_43 = arith.constant 0 : index
    %63 = vector.load %arg4[%c0_41, %c0_42, %c0_43] : memref<1x4x256xbf16, #tpu.memory_space<vmem>>, vector<1x4x256xbf16>
    %64 = vector.shape_cast %63 : vector<1x4x256xbf16> to vector<4x256xbf16>
    %cst_44 = arith.constant dense<0.000000e+00> : vector<64x256xf32>
    %65 = tpu.matmul %62, %64, %cst_44 {dimension_numbers = #tpu.dot_dimension_numbers<[1], [0], [0], [1], [0, 0, 1, 1], [], []>} : vector<64x4xbf16>, vector<4x256xbf16>, vector<64x256xf32> -> vector<64x256xf32>
    %c0_45 = arith.constant 0 : index
    %c0_46 = arith.constant 0 : index
    %66 = vector.load %arg11[%c0_45, %c0_46] : memref<64x1xf32, #tpu.memory_space<vmem>>, vector<64x1xf32>
    %67 = vector.broadcast %66 : vector<64x1xf32> to vector<64x256xf32>
    %68 = arith.addf %65, %67 : vector<64x256xf32>
    %69 = arith.mulf %68, %6 : vector<64x256xf32>
    %cst_47 = arith.constant dense<0.000000e+00> : vector<256xf32>
    %70 = vector.multi_reduction <add>, %69, %cst_47 [0] : vector<64x256xf32> to vector<256xf32>
    %71 = vector.shape_cast %70 : vector<256xf32> to vector<1x256xf32>
    %72 = arith.mulf %68, %68 : vector<64x256xf32>
    %cst_48 = arith.constant dense<0.000000e+00> : vector<256xf32>
    %73 = vector.multi_reduction <add>, %72, %cst_48 [0] : vector<64x256xf32> to vector<256xf32>
    %74 = vector.shape_cast %73 : vector<256xf32> to vector<1x256xf32>
    %cst_49 = arith.constant 1.000000e-16 : f32
    %75 = vector.broadcast %cst_49 : f32 to vector<1x256xf32>
    %76 = arith.maximumf %74, %75 : vector<1x256xf32>
    %77 = arith.mulf %76, %11 : vector<1x256xf32>
    %78 = math.rsqrt %77 : vector<1x256xf32>
    %79 = arith.mulf %71, %78 : vector<1x256xf32>
    %cst_50 = arith.constant 2.500000e-01 : f32
    %80 = vector.broadcast %cst_50 : f32 to vector<1x256xf32>
    %81 = arith.mulf %79, %80 : vector<1x256xf32>
    %cst_51 = arith.constant 2.500000e-01 : f32
    %82 = vector.broadcast %cst_51 : f32 to vector<1x256xf32>
    %83 = arith.addf %81, %82 : vector<1x256xf32>
    %c0_52 = arith.constant 0 : index
    %c2 = arith.constant 2 : index
    %c0_53 = arith.constant 0 : index
    %84 = vector.load %arg14[%c0_52, %c2, %c0_53] : memref<1x3x256xf32, #tpu.memory_space<vmem>>, vector<1x1x256xf32>
    %85 = vector.shape_cast %84 : vector<1x1x256xf32> to vector<1x256xf32>
    %86 = vector.shape_cast %83 : vector<1x256xf32> to vector<1x1x256xf32>
    tpu.vector_store %arg14[%c0_52, %c2, %c0_53], %86 {strides = array<i32>} : memref<1x3x256xf32, #tpu.memory_space<vmem>>, vector<1x1x256xf32>,
    return
  }
  func.func @transform_0(%arg0: i32, %arg1: i32) -> (i32, i32, i32) {
    %c0_i32 = arith.constant 0 : i32
    %c0_i32_0 = arith.constant 0 : i32
    return %arg0, %c0_i32, %arg1 : i32, i32, i32
  }
  func.func @transform_1(%arg0: i32, %arg1: i32) -> (i32, i32, i32) {
    %c0_i32 = arith.constant 0 : i32
    %c0_i32_0 = arith.constant 0 : i32
    return %arg0, %c0_i32, %arg1 : i32, i32, i32
  }
  func.func @transform_2(%arg0: i32, %arg1: i32) -> (i32, i32, i32) {
    %c0_i32 = arith.constant 0 : i32
    %c0_i32_0 = arith.constant 0 : i32
    return %arg0, %c0_i32, %arg1 : i32, i32, i32
  }
  func.func @transform_3(%arg0: i32, %arg1: i32) -> (i32, i32, i32) {
    %c0_i32 = arith.constant 0 : i32
    %c0_i32_0 = arith.constant 0 : i32
    return %arg0, %c0_i32, %arg1 : i32, i32, i32
  }
  func.func @transform_4(%arg0: i32, %arg1: i32) -> (i32, i32) {
    %c0_i32 = arith.constant 0 : i32
    %c0_i32_0 = arith.constant 0 : i32
    %c0_i32_1 = arith.constant 0 : i32
    return %c0_i32, %c0_i32_0 : i32, i32
  }
  func.func @transform_5(%arg0: i32, %arg1: i32) -> (i32, i32) {
    %c0_i32 = arith.constant 0 : i32
    %c0_i32_0 = arith.constant 0 : i32
    %c0_i32_1 = arith.constant 0 : i32
    return %c0_i32, %c0_i32_0 : i32, i32
  }
  func.func @transform_6(%arg0: i32, %arg1: i32) -> (i32, i32) {
    %c0_i32 = arith.constant 0 : i32
    %c0_i32_0 = arith.constant 0 : i32
    %c0_i32_1 = arith.constant 0 : i32
    return %c0_i32, %c0_i32_0 : i32, i32
  }
  func.func @transform_7(%arg0: i32, %arg1: i32) -> (i32, i32) {
    %c0_i32 = arith.constant 0 : i32
    %c0_i32_0 = arith.constant 0 : i32
    %c0_i32_1 = arith.constant 0 : i32
    return %c0_i32, %c0_i32_0 : i32, i32
  }
  func.func @transform_8(%arg0: i32, %arg1: i32) -> (i32, i32) {
    %c0_i32 = arith.constant 0 : i32
    %c0_i32_0 = arith.constant 0 : i32
    %c0_i32_1 = arith.constant 0 : i32
    return %c0_i32, %c0_i32_0 : i32, i32
  }
  func.func @transform_9(%arg0: i32, %arg1: i32) -> (i32, i32) {
    %c0_i32 = arith.constant 0 : i32
    %c0_i32_0 = arith.constant 0 : i32
    %c0_i32_1 = arith.constant 0 : i32
    return %c0_i32, %c0_i32_0 : i32, i32
  }
  func.func @transform_10(%arg0: i32, %arg1: i32) -> (i32, i32) {
    %c0_i32 = arith.constant 0 : i32
    %c0_i32_0 = arith.constant 0 : i32
    %c0_i32_1 = arith.constant 0 : i32
    return %c0_i32, %c0_i32_0 : i32, i32
  }
  func.func @transform_11(%arg0: i32, %arg1: i32) -> (i32, i32) {
    %c0_i32 = arith.constant 0 : i32
    %c0_i32_0 = arith.constant 0 : i32
    %c0_i32_1 = arith.constant 0 : i32
    return %c0_i32, %c0_i32_0 : i32, i32
  }
  func.func @transform_12(%arg0: i32, %arg1: i32) -> (i32, i32, i32) {
    %c0_i32 = arith.constant 0 : i32
    %c0_i32_0 = arith.constant 0 : i32
    return %arg0, %c0_i32, %arg1 : i32, i32, i32
  }
}

</mosaic_0001>

<bundles_post_ra>
// kernel: tpu_custom_call.1
= control target key start
LH: loop header
LB: loop body
LE: loop exit
PB: predicated region body
PF: predicated region fallthrough
CT: control target
= control target key end

     0   :  { %s2037_s21 = smov 0   ;;  %s2039_s22 = smov 0   ;;  %s2584_s0 = inlined_call_operand.vmem [shape: bf16[2,8,256], index: 0, kind: input, shape index: {}]   ;;  %s2585_s1 = inlined_call_operand.vmem [shape: bf16[2,16,256], index: 1, kind: input, shape index: {}]   ;;  %s2586_s2 = inlined_call_operand.vmem [shape: bf16[2,4,256], index: 2, kind: input, shape index: {}]   ;;  %s2587_s3 = inlined_call_operand.vmem [shape: bf16[2,32,256], index: 3, kind: input, shape index: {}]   ;;  %s2588_s4 = inlined_call_operand.vmem [shape: bf16[64,8], index: 4, kind: input, shape index: {}]   ;;  %s2589_s5 = inlined_call_operand.vmem [shape: f32[64,1], index: 5, kind: input, shape index: {}]   ;;  %s2590_s6 = inlined_call_operand.vmem [shape: bf16[64,16], index: 6, kind: input, shape index: {}]   ;;  %s2591_s7 = inlined_call_operand.vmem [shape: f32[64,1], index: 7, kind: input, shape index: {}]   ;;  %s2592_s8 = inlined_call_operand.vmem [shape: bf16[64,4], index: 8, kind: input, shape index: {}]   ;;  %s2593_s9 = inlined_call_operand.vmem [shape: f32[64,1], index: 9, kind: input, shape index: {}]   ;;  %s2594_s10 = inlined_call_operand.vmem [shape: bf16[64,32], index: 10, kind: input, shape index: {}]   ;;  %s2595_s11 = inlined_call_operand.vmem [shape: f32[64,1], index: 11, kind: input, shape index: {}]   ;;  %s2596_s12 = inlined_call_operand.vmem [shape: f32[2,3,256], index: 12, kind: output, shape index: {}]  }
   0x1   :  { %s2041_s23 = smov 0  }
   0x2 LB: > { %s34_s24 = sadd.s32 1, %s1964_s22  ;;  %p1816_p0 = scmp.ge.s32.totalorder %s1968_s23, 1  ;;  %s1968_s23 = sphi %s2041_s23, %s22_s23   ;;  %s1964_s22 = sphi %s2039_s22, %s2631_s22   ;;  %s1960_s21 = sphi %s2037_s21, %s2630_s21  }
   0x3   : > { %p36_p1 = scmp.ge.s32.totalorder %s34_s24, 2  ;;  %p434_p2 = scmp.lt.s32.totalorder %s1968_s23, 3 }
   0x5   : > { %s2633_s24 = smov (%p36_p1, %s34_s24), 0  ;;  %p435_p3 = pnand %p1816_p0, %p434_p2 }
   0x7   : > { %438 = sbr.rel (%p435_p3) target bundleno = 370 (0x172), region = 68 }
   0xe   : > { %p512_p4 = scmp.lt.s32.totalorder %s1960_s21, 1  ;;  %v1970_v0 = vmov 0   ;;  %vm887_vm0 = vcmask 1043456   ;;  %v1914_v7 = vld [vmem:[%s2588_s4] sm:$0xff]   ;;  %vm874_vm1 = vcmask 64512   ;;  %vm1475_vm2 = vcmask 1041408  }
   0xf   : > { %926 = vmatprep.mubr.bf16.mxu1 %v1970_v0  ;;  %707 = vmatprep.mubr.bf16.mxu0 %v1970_v0  ;;  %v1916_v13 = vld [vmem:[%s2594_s10] sm:$0xff]   ;;  %vm662_vm3 = vcmask 261120   ;;  %v802_v18 = vld [vmem:[%s2589_s5 + $0x8] sm:$0xff]  ;;  %v1922_v26 = vld [vmem:[%s2588_s4 + $0x10] sm:$0xff]   ;;  %vm1174_vm4 = vcmask 130048   ;;  %vm1462_vm5 = vcmask 31744  }
  0x10   : > { %s2635_s21 = smov (!%p512_p4, %s1960_s21), 1  ;;  %1906 = vset.pattern.permute.xlu1 %v1970_v0  ;;  %1905 = vset.pattern.permute.xlu0 %v1970_v0  ;;  %v801_v15 = vld [vmem:[%s2589_s5] sm:$0xff]  ;;  %v575_v19 = vld [vmem:[%s2595_s11 + $0x8] sm:$0xff]  ;;  %v803_v27 = vld [vmem:[%s2589_s5 + $0x10] sm:$0xff] }
  0x11   : > { %s1877_s25 = sshll.u32 %s2635_s21, 5  ;;  %s1874_s26 = sshll.u32 %s2635_s21, 3  ;;  %811 = vperm.xlu1 %1906, %v801_v15   ;;  %v574_v16 = vld [vmem:[%s2595_s11] sm:$0xff]  ;;  %v1920_v20 = vld [vmem:[%s2588_s4 + $0x8] sm:$0xff]   ;;  %v1923_v28 = vld [vmem:[%s2594_s10 + $0x10] sm:$0xff]  }
  0x12   : > { %s549_s29 = scalar_lea.vmem %s2587_s3, %s1877_s25  ;;  %s519_s14 = scalar_lea.vmem %s2584_s0, %s1874_s26  ;;  %584 = vperm.xlu0 %1905, %v574_v16   ;;  %v1097_v21 = vld [vmem:[%s2591_s7 + $0x8] sm:$0xff]  ;;  %v1096_v23 = vld [vmem:[%s2591_s7] sm:$0xff]  ;;  %v576_v29 = vld [vmem:[%s2595_s11 + $0x10] sm:$0xff] }
  0x13   : > { %v1907_v1 = vld [vmem:[%s549_s29 + $0x4] ss:$8 sps:$4 sm:$0xff]   ;;  %s1875_s15 = sshll.u32 %s2635_s21, 4  ;;  %v1910_v3 = vld [vmem:[%s549_s29] ss:$8 sps:$4 sm:$0xff]   ;;  %s1876_s19 = sshll.u32 %s2635_s21, 2 }
  0x14   : > { %v800_v2 = vld [vmem:[%s519_s14] sm:$0xff]  ;;  %s529_s18 = scalar_lea.vmem %s2585_s1, %s1875_s15  ;;  %675 = vmatprep.subr.bf16.mxu0 %v1907_v1  ;;  %v1912_v6 = vld [vmem:[%s549_s29 + $0x14] ss:$8 sps:$4 sm:$0xff]   ;;  %v1915_v8 = vld [vmem:[%s549_s29 + $0x10] ss:$8 sps:$4 sm:$0xff]   ;;  %s539_s30 = scalar_lea.vmem %s2586_s2, %s1876_s19 }
  0x15   : > { %v1844_v4 = vcombine.high %v800_v2, %v800_v2  ;;  %v1843_v5 = vcombine.low %v800_v2, %v800_v2  ;;  %676 = vmatpush1.bf16.msra.mxu0 %v1910_v3  ;;  %v1917_v9 = vld [vmem:[%s529_s18] ss:$8 sps:$4 sm:$0xff]   ;;  %v1919_v11 = vld [vmem:[%s529_s18 + $0x4] ss:$8 sps:$4 sm:$0xff]   ;;  %816 = vperm.xlu1 %1906, %v802_v18   ;;  %v1387_v30 = vld [vmem:[%s2593_s9 + $0x10] sm:$0xff]  ;;  %s2534_s17 = scalar_lea.vmem %s2596_s12, %s1874_s26 }
  0x16   : > { %677 = vmatprep.subr.bf16.mxu0 %v1912_v6  ;;  %v1865_v12 = vld.sshfl [vmem:[%s539_s30] sm:$0x33 pattern:$0x76325410]  ;;  %v1921_v22 = vld [vmem:[%s2594_s10 + $0x8] sm:$0xff]   ;;  %589 = vperm.xlu0 %1905, %v575_v19   ;;  %v1098_v31 = vld [vmem:[%s2591_s7 + $0x10] sm:$0xff] }
  0x17   : > { %1845 = vmatprep.subr.msk.bf16.mxu1 %vm887_vm0, %v1844_v4  ;;  %v889_v10 = vsel %vm887_vm0, %v1843_v5, 0  ;;  %v1461_v14 = vcombine.high %v1865_v12, %v1865_v12  ;;  %v1477_v17 = vsel %vm1475_vm2, %v1865_v12, 0  ;;  %v1386_v24 = vld [vmem:[%s2593_s9 + $0x8] sm:$0xff]  ;;  %v1385_v25 = vld [vmem:[%s2593_s9] sm:$0xff]  ;;  %v1924_v32 = vld [vmem:[%s2588_s4 + $0x18] sm:$0xff]  }
  0x18   : > { %895 = vmatpush1.bf16.msra.mxu1 %v889_v10  ;;  %v804_v33 = vld [vmem:[%s2589_s5 + $0x18] sm:$0xff]  ;;  %v1926_v38 = vld [vmem:[%s2590_s6] sm:$0xff]   ;;  %v1928_v44 = vld [vmem:[%s2590_s6 + $0x8] sm:$0xff]  }
  0x19   : > { %1187 = vmatprep.subr.bf16.mxu1 %v1919_v11  ;;  %678 = vmatpush1.bf16.msra.mxu0 %v1915_v8  ;;  %v1925_v34 = vld [vmem:[%s2594_s10 + $0x18] sm:$0xff]   ;;  %v805_v39 = vld [vmem:[%s2589_s5 + $0x20] sm:$0xff]  ;;  %v806_v45 = vld [vmem:[%s2589_s5 + $0x28] sm:$0xff] }
  0x1a   : > { %1866 = vmatprep.subr.msk.bf16.mxu0 %vm1475_vm2, %v1461_v14  ;;  %1111 = vperm.xlu1 %1906, %v1097_v21   ;;  %v577_v35 = vld [vmem:[%s2595_s11 + $0x18] sm:$0xff]  ;;  %v1927_v40 = vld [vmem:[%s2592_s8] sm:$0xff]   ;;  %v1929_v46 = vld [vmem:[%s2592_s8 + $0x8] sm:$0xff]  }
  0x1b   : > { %1846 = vmatmul.mubr.msk.bf16.vlgmr.msra.gmra.mrb[0].mxu1 %vm874_vm1, %v1914_v7  ;;  %1106 = vperm.xlu0 %1905, %v1096_v23   ;;  %v1388_v36 = vld [vmem:[%s2593_s9 + $0x18] sm:$0xff]  ;;  %v578_v41 = vld [vmem:[%s2595_s11 + $0x20] sm:$0xff]  ;;  %v579_v47 = vld [vmem:[%s2595_s11 + $0x28] sm:$0xff] }
  0x1c   : > { %1188 = vmatpush1.bf16.msra.mxu1 %v1917_v9  ;;  %936 = vmatprep.mubr.bf16.mxu1 %v1970_v0  ;;  %v1099_v37 = vld [vmem:[%s2591_s7 + $0x18] sm:$0xff]  ;;  %v1389_v42 = vld [vmem:[%s2593_s9 + $0x20] sm:$0xff]  ;;  %v1390_v48 = vld [vmem:[%s2593_s9 + $0x28] sm:$0xff] }
  0x1d   : > { %1835 = vmatmul.mubr.msk.bf16.vlgmr.msra.gmra.mrb[0].mxu0 %vm662_vm3, %v1916_v13  ;;  %v1100_v43 = vld [vmem:[%s2591_s7 + $0x20] sm:$0xff]  ;;  %v1101_v49 = vld [vmem:[%s2591_s7 + $0x28] sm:$0xff]  ;;  %v1930_v50 = vld [vmem:[%s2590_s6 + $0x10] sm:$0xff]  }
  0x1e   : > { %1483 = vmatpush1.bf16.msra.mxu0 %v1477_v17  ;;  %717 = vmatprep.mubr.bf16.mxu0 %v1970_v0  ;;  %v807_v51 = vld [vmem:[%s2589_s5 + $0x30] sm:$0xff]  ;;  %v1932_v56 = vld [vmem:[%s2590_s6 + $0x18] sm:$0xff]  }
  0x1f   : > { %1400 = vperm.xlu1 %1906, %v1386_v24   ;;  %1395 = vperm.xlu0 %1905, %v1385_v25   ;;  %v1931_v52 = vld [vmem:[%s2592_s8 + $0x10] sm:$0xff]   ;;  %v808_v57 = vld [vmem:[%s2589_s5 + $0x38] sm:$0xff] }
  0x20   : > { %v580_v53 = vld [vmem:[%s2595_s11 + $0x30] sm:$0xff]  ;;  %v1933_v58 = vld [vmem:[%s2592_s8 + $0x18] sm:$0xff]  }
  0x21   : > { %v1391_v54 = vld [vmem:[%s2593_s9 + $0x30] sm:$0xff]  ;;  %v581_v59 = vld [vmem:[%s2595_s11 + $0x38] sm:$0xff] }
  0x22   : > { %v1102_v55 = vld [vmem:[%s2591_s7 + $0x30] sm:$0xff]  ;;  %v1392_v60 = vld [vmem:[%s2593_s9 + $0x38] sm:$0xff] }
  0x23   : > { %1847 = vmatmul.mubr.msk.bf16.gmra.mrb[4].mxu1 %vm874_vm1, %v1920_v20  ;;  %821 = vperm.xlu1 %1906, %v803_v27   ;;  %v1103_v61 = vld [vmem:[%s2591_s7 + $0x38] sm:$0xff] }
  0x24   : > { %946 = vmatprep.mubr.bf16.mxu1 %v1970_v0  ;;  %594 = vperm.xlu0 %1905, %v576_v29  }
  0x25   : > { %1836 = vmatmul.mubr.msk.bf16.gmra.mrb[4].mxu0 %vm662_vm3, %v1921_v22 }
  0x26   : > { %727 = vmatprep.mubr.bf16.mxu0 %v1970_v0 }
  0x27   : > { %1405 = vperm.xlu1 %1906, %v1387_v30  }
  0x28   : > { %1116 = vperm.xlu0 %1905, %v1098_v31  }
  0x2b   : > { %1848 = vmatmul.mubr.msk.bf16.gmra.mrb[8].mxu1 %vm874_vm1, %v1922_v26  ;;  %826 = vperm.xlu1 %1906, %v804_v33  }
  0x2c   : > { %956 = vmatprep.mubr.bf16.mxu1 %v1970_v0  ;;  %599 = vperm.xlu0 %1905, %v577_v35  }
  0x2d   : > { %1837 = vmatmul.mubr.msk.bf16.gmra.mrb[8].mxu0 %vm662_vm3, %v1923_v28 }
  0x2e   : > { %737 = vmatprep.mubr.bf16.mxu0 %v1970_v0 }
  0x2f   : > { %1410 = vperm.xlu1 %1906, %v1388_v36  }
  0x30   : > { %1121 = vperm.xlu0 %1905, %v1099_v37  }
  0x33   : > { %1849 = vmatmul.mubr.msk.bf16.gmra.mrb[12].mxu1 %vm874_vm1, %v1924_v32  ;;  %831 = vperm.xlu1 %1906, %v805_v39  }
  0x34   : > { %1219 = vmatprep.mubr.bf16.mxu1 %v1970_v0  ;;  %604 = vperm.xlu0 %1905, %v578_v41  }
  0x35   : > { %1838 = vmatmul.mubr.msk.bf16.gmra.mrb[12].mxu0 %vm662_vm3, %v1925_v34 }
  0x36   : > { %1514 = vmatprep.mubr.bf16.mxu0 %v1970_v0 }
  0x37   : > { %1415 = vperm.xlu1 %1906, %v1389_v42  }
  0x38   : > { %1126 = vperm.xlu0 %1905, %v1100_v43  }
  0x3b   : > { %1856 = vmatmul.mubr.msk.bf16.vlgmr.msra.gmra.mrb[16].mxu1 %vm1174_vm4, %v1926_v38  ;;  %836 = vperm.xlu1 %1906, %v806_v45   ;;  %v2597_v45 = vlaneseq }
  0x3c   : > { %1229 = vmatprep.mubr.bf16.mxu1 %v1970_v0  ;;  %609 = vperm.xlu0 %1905, %v579_v47  }
  0x3d   : > { %1867 = vmatmul.mubr.msk.bf16.vlgmr.msra.gmra.mrb[16].mxu0 %vm1462_vm5, %v1927_v40  ;;  %v1971_v40 = vmov 1966171168  }
  0x3e   : > { %1524 = vmatprep.mubr.bf16.mxu0 %v1970_v0  ;;  %v2296_v41 = vunpack.c.l.s4 %v1971_v40 }
  0x3f   : > { %1420 = vperm.xlu1 %1906, %v1390_v48  }
  0x40   : > { %1131 = vperm.xlu0 %1905, %v1101_v49  }
  0x43   : > { %1857 = vmatmul.mubr.msk.bf16.gmra.mrb[20].mxu1 %vm1174_vm4, %v1928_v44  ;;  %841 = vperm.xlu1 %1906, %v807_v51  }
  0x44   : > { %1239 = vmatprep.mubr.bf16.mxu1 %v1970_v0  ;;  %614 = vperm.xlu0 %1905, %v580_v53  }
  0x45   : > { %1868 = vmatmul.mubr.msk.bf16.gmra.mrb[20].mxu0 %vm1462_vm5, %v1929_v46 }
  0x46   : > { %1534 = vmatprep.mubr.bf16.mxu0 %v1970_v0 }
  0x47   : > { %1425 = vperm.xlu1 %1906, %v1391_v54  }
  0x48   : > { %1136 = vperm.xlu0 %1905, %v1102_v55  }
  0x4b   : > { %1858 = vmatmul.mubr.msk.bf16.gmra.mrb[24].mxu1 %vm1174_vm4, %v1930_v50  ;;  %846 = vperm.xlu1 %1906, %v808_v57  }
  0x4c   : > { %1249 = vmatprep.mubr.bf16.mxu1 %v1970_v0  ;;  %619 = vperm.xlu0 %1905, %v581_v59  }
  0x4d   : > { %1869 = vmatmul.mubr.msk.bf16.gmra.mrb[24].mxu0 %vm1462_vm5, %v1931_v52 }
  0x4e   : > { %1544 = vmatprep.mubr.bf16.mxu0 %v1970_v0 }
  0x4f   : > { %1430 = vperm.xlu1 %1906, %v1392_v60  }
  0x50   : > { %1141 = vperm.xlu0 %1905, %v1103_v61  }
  0x53   : > { %1859 = vmatmul.mubr.msk.bf16.gmra.mrb[28].mxu1 %vm1174_vm4, %v1932_v56 }
  0x55   : > { %1870 = vmatmul.mubr.msk.bf16.gmra.mrb[28].mxu0 %vm1462_vm5, %v1933_v58 }
  0x90   : > { %v812_v62 = vpop.permute.xlu1 %811 }
  0x91   : > { %v585_v63 = vpop.permute.xlu0 %584 }
  0x94   : > { %v817_v0 = vpop.permute.xlu1 %816 }
  0x95   : > { %v590_v1 = vpop.permute.xlu0 %589 }
  0x99   : > { %v2253_v2 = vpop.permute.xlu1 %1111 }
  0x9a   : > { %v2255_v3 = vpop.permute.xlu0 %1106 }
  0x9e   : > { %v2257_v4 = vpop.permute.xlu1 %1400  ;;  %v2259_v5 = vpop.permute.xlu0 %1395 }
  0xa2   : > { %v822_v6 = vpop.permute.xlu1 %821 }
  0xa3   : > { %v2261_v7 = vpop.permute.xlu0 %594 }
  0xa6   : > { %v2263_v8 = vpop.permute.xlu1 %1405 }
  0xa7   : > { %v2265_v9 = vpop.permute.xlu0 %1116 }
  0xaa   : > { %v2267_v10 = vpop.permute.xlu1 %826 }
  0xab   : > { %v2269_v11 = vpop.permute.xlu0 %599 }
  0xae   : > { %v2271_v12 = vpop.permute.xlu1 %1410 }
  0xaf   : > { %v2273_v13 = vpop.permute.xlu0 %1121 }
  0xb2   : > { %v2275_v14 = vpop.permute.xlu1 %831 }
  0xb3   : > { %v2277_v15 = vpop.permute.xlu0 %604 }
  0xb6   : > { %v2279_v16 = vpop.permute.xlu1 %1415 }
  0xb7   : > { %v2281_v17 = vpop.permute.xlu0 %1126 }
  0xba   : > { %v2283_v18 = vpop.permute.xlu1 %836 }
  0xbb   : > { %v2285_v19 = vpop.permute.xlu0 %609 }
  0xbe   : > { %v2287_v21 = vpop.permute.xlu1 %1420 }
  0xbf   : > { %v2306_v50 = vpop.permute.xlu0 %1131 }
  0xc2   : > { %v2313_v56 = vpop.permute.xlu1 %841 }
  0xee   : > { %v928_v20 = vpop.f32.mrb[0].mxu1 }
  0xef   : > { %v929_v22 = vadd.f32 %v928_v20, %v812_v62  ;;  %v930_v23 = vpop.f32.mrb[1].mxu1 }
  0xf0   : > { %v931_v24 = vadd.f32 %v930_v23, %v812_v62  ;;  %v932_v25 = vpop.f32.mrb[2].mxu1  ;;  %v709_v26 = vpop.f32.mrb[0].mxu0 }
  0xf1   : > { %v1009_v27 = vmul.f32 %v929_v22, %v929_v22  ;;  %v933_v28 = vadd.f32 %v932_v25, %v817_v0  ;;  %v2289_v29 = vadd.f32 %v709_v26, %v585_v63  ;;  %v934_v30 = vpop.f32.mrb[3].mxu1  ;;  %v711_v31 = vpop.f32.mrb[1].mxu0  ;;  %v1068_v26 = vunpack.c.0.s8 %v2296_v41 }
  0xf2   : > { %v1010_v32 = vmul.f32 %v931_v24, %v931_v24  ;;  %v935_v33 = vadd.f32 %v934_v30, %v817_v0  ;;  %v2291_v34 = vadd.f32 %v711_v31, %v585_v63  ;;  %v713_v35 = vpop.f32.mrb[2].mxu0 }
  0xf3   : > { %v1011_v36 = vmul.f32 %v933_v28, %v933_v28  ;;  %v967_v37 = vmul.f32 %v929_v22, %v2289_v29  ;;  %v2294_v38 = vadd.f32 %v713_v35, %v590_v1  ;;  %v715_v39 = vpop.f32.mrb[3].mxu0  ;;  %v748_v47 = vmul.f32 %v2289_v29, %v2289_v29 }
  0xf4   : > { %v1012_v42 = vmul.f32 %v935_v33, %v935_v33  ;;  %v968_v43 = vmul.f32 %v931_v24, %v2291_v34  ;;  %v2299_v44 = vadd.f32 %v715_v39, %v590_v1  ;;  %v749_v52 = vmul.f32 %v2291_v34, %v2291_v34 }
  0xf5   : > { %v1025_v46 = vadd.f32 %v1011_v36, %v1009_v27  ;;  %v750_v48 = vmul.f32 %v2294_v38, %v2294_v38  ;;  %v969_v49 = vmul.f32 %v933_v28, %v2294_v38 }
  0xf6   : > { %v1038_v51 = vadd.f32 %v1012_v42, %v1010_v32  ;;  %v751_v53 = vmul.f32 %v2299_v44, %v2299_v44  ;;  %v970_v54 = vmul.f32 %v935_v33, %v2299_v44  ;;  %v938_v55 = vpop.f32.mrb[4].mxu1 }
  0xf7   : > { %v764_v57 = vadd.f32 %v750_v48, %v748_v47  ;;  %v983_v58 = vadd.f32 %v969_v49, %v967_v37  ;;  %v939_v59 = vadd.f32 %v938_v55, %v822_v6  ;;  %v940_v60 = vpop.f32.mrb[5].mxu1 }
  0xf8   : > { %v777_v61 = vadd.f32 %v751_v53, %v749_v52  ;;  %v996_v62 = vadd.f32 %v970_v54, %v968_v43  ;;  %v941_v63 = vadd.f32 %v940_v60, %v822_v6  ;;  %v942_v0 = vpop.f32.mrb[6].mxu1  ;;  %v719_v1 = vpop.f32.mrb[4].mxu0  ;;  %v1070_v6 = vshrl.u32 %v2597_v45, 7 }
  0xf9   : > { %v1013_v20 = vmul.f32 %v939_v59, %v939_v59  ;;  %v943_v22 = vadd.f32 %v942_v0, %v2267_v10  ;;  %v944_v23 = vpop.f32.mrb[7].mxu1  ;;  %v2317_v24 = vadd.f32 %v719_v1, %v2261_v7  ;;  %v721_v25 = vpop.f32.mrb[5].mxu0 }
  0xfa   : > { %v1014_v27 = vmul.f32 %v941_v63, %v941_v63  ;;  %v945_v28 = vadd.f32 %v944_v23, %v2267_v10  ;;  %v2322_v30 = vadd.f32 %v721_v25, %v2261_v7  ;;  %v723_v31 = vpop.f32.mrb[6].mxu0  ;;  %v2339_v54 = vpop.permute.xlu1 %1425  ;;  %v2349_v0 = vsub.s32 %v1068_v26, %v1070_v6 }
  0xfb   : > { %v1026_v32 = vadd.f32 %v1025_v46, %v1013_v20  ;;  %v1015_v33 = vmul.f32 %v943_v22, %v943_v22  ;;  %v752_v35 = vmul.f32 %v2317_v24, %v2317_v24  ;;  %v971_v36 = vmul.f32 %v939_v59, %v2317_v24  ;;  %v725_v37 = vpop.f32.mrb[7].mxu0  ;;  %v2334_v46 = vpop.permute.xlu0 %614  ;;  %2611 = vst [vmem:[#allocation2_spill] sm:$0xff] %v2339_v54 }
  0xfc   : > { %v1039_v39 = vadd.f32 %v1038_v51, %v1014_v27  ;;  %v1016_v40 = vmul.f32 %v945_v28, %v945_v28  ;;  %v753_v41 = vmul.f32 %v2322_v30, %v2322_v30  ;;  %v972_v10 = vmul.f32 %v941_v63, %v2322_v30  ;;  %2612 = vst [vmem:[#allocation3_spill] sm:$0xff] %v2349_v0 }
  0xfd   : > { %v1027_v7 = vadd.f32 %v1026_v32, %v1015_v33  ;;  %v765_v42 = vadd.f32 %v764_v57, %v752_v35  ;;  %v984_v43 = vadd.f32 %v983_v58, %v971_v36  ;;  %v2332_v47 = vadd.f32 %v723_v31, %v2269_v11 }
  0xfe   : > { %v1040_v48 = vadd.f32 %v1039_v39, %v1016_v40  ;;  %v778_v49 = vadd.f32 %v777_v61, %v753_v41  ;;  %v997_v52 = vadd.f32 %v996_v62, %v972_v10  ;;  %v2337_v53 = vadd.f32 %v725_v37, %v2269_v11  ;;  %v948_v51 = vpop.f32.mrb[8].mxu1 }
  0xff   : > { %v754_v55 = vmul.f32 %v2332_v47, %v2332_v47  ;;  %v973_v57 = vmul.f32 %v943_v22, %v2332_v47  ;;  %v949_v58 = vadd.f32 %v948_v51, %v2275_v14  ;;  %v950_v59 = vpop.f32.mrb[9].mxu1  ;;  %v2359_v39 = vpop.permute.xlu0 %1136 }
 0x100   : > { %v755_v60 = vmul.f32 %v2337_v53, %v2337_v53  ;;  %v974_v61 = vmul.f32 %v945_v28, %v2337_v53  ;;  %v951_v62 = vadd.f32 %v950_v59, %v2275_v14  ;;  %v952_v11 = vpop.f32.mrb[10].mxu1  ;;  %v729_v63 = vpop.f32.mrb[8].mxu0  ;;  %2613 = vst [vmem:[#allocation4_spill] sm:$0xff] %v2359_v39 }
 0x101   : > { %v766_v1 = vadd.f32 %v765_v42, %v754_v55  ;;  %v985_v20 = vadd.f32 %v984_v43, %v973_v57  ;;  %v1017_v23 = vmul.f32 %v949_v58, %v949_v58  ;;  %v953_v25 = vadd.f32 %v952_v11, %v2283_v18  ;;  %v954_v22 = vpop.f32.mrb[11].mxu1  ;;  %v731_v27 = vpop.f32.mrb[9].mxu0 }
 0x102   : > { %v779_v31 = vadd.f32 %v778_v49, %v755_v60  ;;  %v998_v32 = vadd.f32 %v997_v52, %v974_v61  ;;  %v1018_v33 = vmul.f32 %v951_v62, %v951_v62  ;;  %v955_v35 = vadd.f32 %v954_v22, %v2283_v18  ;;  %v733_v36 = vpop.f32.mrb[10].mxu0 }
 0x103   : > { %v1028_v28 = vadd.f32 %v1027_v7, %v1017_v23  ;;  %v1019_v37 = vmul.f32 %v953_v25, %v953_v25  ;;  %v2354_v14 = vadd.f32 %v729_v63, %v2277_v15  ;;  %v2357_v26 = vadd.f32 %v731_v27, %v2277_v15  ;;  %v735_v6 = vpop.f32.mrb[11].mxu0 }
 0x104   : > { %v1041_v40 = vadd.f32 %v1040_v48, %v1018_v33  ;;  %v1020_v41 = vmul.f32 %v955_v35, %v955_v35  ;;  %v2362_v10 = vadd.f32 %v733_v36, %v2285_v19  ;;  %v2365_v42 = vadd.f32 %v735_v6, %v2285_v19  ;;  %v847_v19 = vpop.permute.xlu1 %846 }
 0x105   : > { %v1029_v18 = vadd.f32 %v1028_v28, %v1019_v37  ;;  %v756_v7 = vmul.f32 %v2354_v14, %v2354_v14  ;;  %v975_v43 = vmul.f32 %v949_v58, %v2354_v14  ;;  %v757_v15 = vmul.f32 %v2357_v26, %v2357_v26 }
 0x106   : > { %2614 = vst [vmem:[#allocation5_spill] sm:$0xff] %v2365_v42  ;;  %v1042_v49 = vadd.f32 %v1041_v40, %v1020_v41  ;;  %v976_v52 = vmul.f32 %v951_v62, %v2357_v26  ;;  %v758_v48 = vmul.f32 %v2362_v10, %v2362_v10  ;;  %v977_v51 = vmul.f32 %v953_v25, %v2362_v10  ;;  %v958_v55 = vpop.f32.mrb[12].mxu1 }
 0x107   : > { %v767_v57 = vadd.f32 %v766_v1, %v756_v7  ;;  %v986_v59 = vadd.f32 %v985_v20, %v975_v43  ;;  %v780_v60 = vadd.f32 %v779_v31, %v757_v15  ;;  %v759_v61 = vmul.f32 %v2365_v42, %v2365_v42  ;;  %v960_v58 = vpop.f32.mrb[13].mxu1  ;;  %v620_v31 = vpop.permute.xlu0 %619 }
 0x108   : > { %v999_v11 = vadd.f32 %v998_v32, %v976_v52  ;;  %v978_v63 = vmul.f32 %v955_v35, %v2365_v42  ;;  %v959_v23 = vadd.f32 %v958_v55, %v2313_v56  ;;  %v961_v62 = vadd.f32 %v960_v58, %v2313_v56  ;;  %v962_v22 = vpop.f32.mrb[14].mxu1  ;;  %v739_v27 = vpop.f32.mrb[12].mxu0 }
 0x109   : > { %v768_v33 = vadd.f32 %v767_v57, %v758_v48  ;;  %v987_v25 = vadd.f32 %v986_v59, %v977_v51  ;;  %v781_v36 = vadd.f32 %v780_v60, %v759_v61  ;;  %v963_v28 = vadd.f32 %v962_v22, %v847_v19  ;;  %v964_v1 = vpop.f32.mrb[15].mxu1  ;;  %v741_v20 = vpop.f32.mrb[13].mxu0 }
 0x10a   : > { %v1000_v37 = vadd.f32 %v999_v11, %v978_v63  ;;  %v1021_v6 = vmul.f32 %v959_v23, %v959_v23  ;;  %v1022_v40 = vmul.f32 %v961_v62, %v961_v62  ;;  %v965_v41 = vadd.f32 %v964_v1, %v847_v19  ;;  %v743_v32 = vpop.f32.mrb[14].mxu0 }
 0x10b   : > { %v1023_v7 = vmul.f32 %v963_v28, %v963_v28  ;;  %v2382_v35 = vadd.f32 %v739_v27, %v2334_v46  ;;  %v2385_v56 = vadd.f32 %v741_v20, %v2334_v46  ;;  %v2387_v43 = vadd.f32 %v743_v32, %v620_v31  ;;  %v745_v15 = vpop.f32.mrb[15].mxu0 }
 0x10c   : > { %v1030_v52 = vadd.f32 %v1029_v18, %v1021_v6  ;;  %v1043_v48 = vadd.f32 %v1042_v49, %v1022_v40  ;;  %v1024_v51 = vmul.f32 %v965_v41, %v965_v41  ;;  %v2389_v55 = vadd.f32 %v745_v15, %v620_v31 }
 0x10d   : > { %2615 = vst [vmem:[#allocation6_spill] sm:$0xff] %v2382_v35  ;;  %2616 = vst [vmem:[#allocation7_spill] sm:$0xff] %v2385_v56  ;;  %v760_v57 = vmul.f32 %v2382_v35, %v2382_v35  ;;  %v979_v19 = vmul.f32 %v959_v23, %v2382_v35  ;;  %v761_v59 = vmul.f32 %v2385_v56, %v2385_v56 }
 0x10e   : > { %2617 = vst [vmem:[#allocation8_spill] sm:$0xff] %v2387_v43  ;;  %2618 = vst [vmem:[#allocation9_spill] sm:$0xff] %v2389_v55  ;;  %v980_v60 = vmul.f32 %v961_v62, %v2385_v56  ;;  %v1031_v46 = vadd.f32 %v1030_v52, %v1023_v7  ;;  %v1044_v61 = vadd.f32 %v1043_v48, %v1024_v51  ;;  %v1221_v49 = vpop.f32.mrb[16].mxu1 }
 0x10f   : > { %v762_v58 = vmul.f32 %v2387_v43, %v2387_v43  ;;  %v981_v18 = vmul.f32 %v963_v28, %v2387_v43  ;;  %v769_v11 = vadd.f32 %v768_v33, %v760_v57  ;;  %v988_v63 = vadd.f32 %v987_v25, %v979_v19  ;;  %v1223_v1 = vpop.f32.mrb[17].mxu1 }
 0x110   : > { %v782_v22 = vadd.f32 %v781_v36, %v761_v59  ;;  %v1001_v27 = vadd.f32 %v1000_v37, %v980_v60  ;;  %v1032_v20 = vrot.slane %v1031_v46, 4  ;;  %v1045_v23 = vrot.slane %v1044_v61, 4  ;;  %v1225_v6 = vpop.f32.mrb[18].mxu1  ;;  %v2403_v40 = vpop.f32.mrb[16].mxu0 }
 0x111   : > { %v763_v31 = vmul.f32 %v2389_v55, %v2389_v55  ;;  %v982_v62 = vmul.f32 %v965_v41, %v2389_v55  ;;  %v770_v32 = vadd.f32 %v769_v11, %v762_v58  ;;  %v989_v7 = vadd.f32 %v988_v63, %v981_v18  ;;  %v1227_v25 = vpop.f32.mrb[19].mxu1  ;;  %v1518_v36 = vpop.f32.mrb[17].mxu0 }
 0x112   : > { %v1222_v28 = vadd.f32 %v1221_v49, %v2255_v3  ;;  %v1224_v33 = vadd.f32 %v1223_v1, %v2255_v3  ;;  %v1033_v37 = vadd.f32 %v1032_v20, %v1031_v46  ;;  %v1046_v15 = vadd.f32 %v1045_v23, %v1044_v61  ;;  %v1520_v51 = vpop.f32.mrb[18].mxu0 }
 0x113   : > { %v783_v52 = vadd.f32 %v782_v22, %v763_v31  ;;  %v1002_v48 = vadd.f32 %v1001_v27, %v982_v62  ;;  %v771_v57 = vrot.slane %v770_v32, 4  ;;  %v990_v19 = vrot.slane %v989_v7, 4  ;;  %v2408_v60 = vpop.f32.mrb[19].mxu0 }
 0x114   : > { %v1260_v41 = vmul.f32 %v1222_v28, %v2289_v29  ;;  %v1302_v59 = vmul.f32 %v1222_v28, %v1222_v28  ;;  %v1034_v58 = vrot.slane %v1033_v37, 2  ;;  %v1047_v18 = vrot.slane %v1046_v15, 2 }
 0x115   : > { %v784_v11 = vrot.slane %v783_v52, 4  ;;  %v1003_v49 = vrot.slane %v1002_v48, 4  ;;  %v772_v63 = vadd.f32 %v771_v57, %v770_v32  ;;  %v991_v3 = vadd.f32 %v990_v19, %v989_v7 }
 0x116   : > { %v1261_v1 = vmul.f32 %v1224_v33, %v2291_v34  ;;  %v1303_v46 = vmul.f32 %v1224_v33, %v1224_v33  ;;  %v1035_v61 = vadd.f32 %v1034_v58, %v1033_v37  ;;  %v1048_v22 = vadd.f32 %v1047_v18, %v1046_v15  ;;  %v1231_v23 = vpop.f32.mrb[20].mxu1 }
 0x117   : > { %v785_v27 = vadd.f32 %v784_v11, %v783_v52  ;;  %v1004_v20 = vadd.f32 %v1003_v49, %v1002_v48  ;;  %v773_v31 = vrot.slane %v772_v63, 2  ;;  %v992_v62 = vrot.slane %v991_v3, 2  ;;  %v1233_v55 = vpop.f32.mrb[21].mxu1 }
 0x118   : > { %v1226_v28 = vadd.f32 %v1225_v6, %v2253_v2  ;;  %v1228_v45 = vadd.f32 %v1227_v25, %v2253_v2  ;;  %v1036_v43 = vrot.slane %v1035_v61, 1  ;;  %v1049_v56 = vrot.slane %v1048_v22, 1  ;;  %v1235_v7 = vpop.f32.mrb[22].mxu1  ;;  %v2413_v57 = vpop.f32.mrb[20].mxu0 }
 0x119   : > { %v786_v35 = vrot.slane %v785_v27, 2  ;;  %v1005_v32 = vrot.slane %v1004_v20, 2  ;;  %v774_v33 = vadd.f32 %v773_v31, %v772_v63  ;;  %v993_v37 = vadd.f32 %v992_v62, %v991_v3  ;;  %v2416_v48 = vpop.f32.mrb[23].mxu1  ;;  %v2418_v19 = vpop.f32.mrb[21].mxu0 }
 0x11a   : > { %v1262_v15 = vmul.f32 %v1226_v28, %v2294_v38  ;;  %v1304_v52 = vmul.f32 %v1226_v28, %v1226_v28  ;;  %v1037_v6 = vadd.f32 %v1036_v43, %v1035_v61  ;;  %v1050_v58 = vadd.f32 %v1049_v56, %v1048_v22  ;;  %v2420_v18 = vpop.f32.mrb[22].mxu0 }
 0x11b   : > { %v787_v2 = vadd.f32 %v786_v35, %v785_v27  ;;  %v1006_v25 = vadd.f32 %v1005_v32, %v1004_v20  ;;  %v775_v11 = vrot.slane %v774_v33, 1  ;;  %v994_v49 = vrot.slane %v993_v37, 1  ;;  %v2422_v0 = vpop.f32.mrb[23].mxu0 }
 0x11c   : > { %v1276_v54 = vadd.f32 %v1262_v15, %v1260_v41  ;;  %v1318_v39 = vadd.f32 %v1304_v52, %v1302_v59  ;;  %v1051_v63 = vmax.f32 %v1037_v6, 1e-16  ;;  %v1052_v3 = vmax.f32 %v1050_v58, 1e-16 }
 0x11d   : > { %v788_v31 = vrot.slane %v787_v2, 1  ;;  %v1007_v62 = vrot.slane %v1006_v25, 1  ;;  %v776_v28 = vadd.f32 %v775_v11, %v774_v33  ;;  %v2424_v42 = vadd.f32 %v994_v49, %v993_v37 }
 0x11e   : > { %v1263_v43 = vmul.f32 %v1228_v45, %v2299_v44  ;;  %v1305_v56 = vmul.f32 %v1228_v45, %v1228_v45  ;;  %v1517_v22 = vadd.f32 %v2403_v40, %v2259_v5  ;;  %v1519_v41 = vadd.f32 %v1518_v36, %v2259_v5  ;;  %v2432_v59 = vpop.f32.mrb[24].mxu1 }
 0x11f   : > { %v789_v35 = vadd.f32 %v788_v31, %v787_v2  ;;  %v2427_v61 = vadd.f32 %v1007_v62, %v1006_v25  ;;  %v2434_v27 = vmax.f32 %v776_v28, 1e-16  ;;  %v1521_v33 = vadd.f32 %v1520_v51, %v2257_v4  ;;  %v2437_v37 = vpop.f32.mrb[25].mxu1 }
 0x120   : > { %v1289_v20 = vadd.f32 %v1263_v43, %v1261_v1  ;;  %v1331_v32 = vadd.f32 %v1305_v56, %v1303_v46  ;;  %v1555_v45 = vmul.f32 %v1517_v22, %v2289_v29  ;;  %v1597_v52 = vmul.f32 %v1517_v22, %v1517_v22  ;;  %v2443_v40 = vpop.f32.mrb[26].mxu1  ;;  %v2445_v5 = vpop.f32.mrb[24].mxu0 }
 0x121   : > { %v2439_v15 = vmax.f32 %v789_v35, 1e-16  ;;  %v1556_v6 = vmul.f32 %v1519_v41, %v2291_v34  ;;  %v1053_v36 = vmul.f32 %v1051_v63, %v2434_v27  ;;  %v1598_v58 = vmul.f32 %v1519_v41, %v1519_v41  ;;  %v2449_v51 = vpop.f32.mrb[27].mxu1  ;;  %v2451_v2 = vpop.f32.mrb[25].mxu0 }
 0x122   : > { %v1557_v1 = vmul.f32 %v1521_v33, %v2294_v38  ;;  %v1599_v46 = vmul.f32 %v1521_v33, %v1521_v33  ;;  %v1523_v29 = vadd.f32 %v2408_v60, %v2257_v4  ;;  %v1232_v34 = vadd.f32 %v1231_v23, %v2265_v9  ;;  %v2458_v49 = vpop.f32.mrb[26].mxu0 }
 0x123   : > { %v1054_v25 = vmul.f32 %v1052_v3, %v2439_v15  ;;  %v1234_v11 = vadd.f32 %v1233_v55, %v2265_v9  ;;  %1934 = vrsqrt.f32 %v1053_v36  ;;  %v1236_v38 = vadd.f32 %v1235_v7, %v2273_v13  ;;  %v2461_v62 = vpop.f32.mrb[27].mxu0 }
 0x124   : > { %v1571_v63 = vadd.f32 %v1557_v1, %v1555_v45  ;;  %v1613_v31 = vadd.f32 %v1599_v46, %v1597_v52  ;;  %v1558_v28 = vmul.f32 %v1523_v29, %v2299_v44  ;;  %v1600_v3 = vmul.f32 %v1523_v29, %v1523_v29 }
 0x125   : > { %1936 = vrsqrt.f32 %v1054_v25  ;;  %v1264_v43 = vmul.f32 %v1232_v34, %v2317_v24  ;;  %v1306_v4 = vmul.f32 %v1232_v34, %v1232_v34  ;;  %v1265_v60 = vmul.f32 %v1234_v11, %v2322_v30 }
 0x126   : > { %v1307_v23 = vmul.f32 %v1234_v11, %v1234_v11  ;;  %v1266_v9 = vmul.f32 %v1236_v38, %v2332_v47  ;;  %v1584_v55 = vadd.f32 %v1558_v28, %v1556_v6  ;;  %v1626_v56 = vadd.f32 %v1600_v3, %v1598_v58  ;;  %v2467_v41 = vpop.f32.mrb[28].mxu1 }
 0x127   : > { %v1277_v35 = vadd.f32 %v1276_v54, %v1264_v43  ;;  %v1308_v22 = vmul.f32 %v1236_v38, %v1236_v38  ;;  %v1319_v7 = vadd.f32 %v1318_v39, %v1306_v4  ;;  %v1290_v33 = vadd.f32 %v1289_v20, %v1265_v60  ;;  %v2471_v52 = vpop.f32.mrb[29].mxu1 }
 0x128   : > { %v1332_v45 = vadd.f32 %v1331_v32, %v1307_v23  ;;  %v1238_v44 = vadd.f32 %v2416_v48, %v2273_v13  ;;  %v1527_v1 = vadd.f32 %v2413_v57, %v2263_v8  ;;  %v1529_v6 = vadd.f32 %v2418_v19, %v2263_v8  ;;  %v2479_v58 = vpop.f32.mrb[30].mxu1  ;;  %v2481_v39 = vpop.f32.mrb[28].mxu0 }
 0x129   : > { %v1278_v36 = vadd.f32 %v1277_v35, %v1266_v9  ;;  %v1531_v54 = vadd.f32 %v2420_v18, %v2271_v12  ;;  %v1320_v20 = vadd.f32 %v1319_v7, %v1308_v22  ;;  %v1533_v48 = vadd.f32 %v2422_v0, %v2271_v12  ;;  %v2486_v46 = vpop.f32.mrb[31].mxu1  ;;  %v2488_v57 = vpop.f32.mrb[29].mxu0 }
 0x12a   : > { %v1267_v32 = vmul.f32 %v1238_v44, %v2337_v53  ;;  %v1309_v13 = vmul.f32 %v1238_v44, %v1238_v44  ;;  %v1559_v8 = vmul.f32 %v1527_v1, %v2317_v24  ;;  %v1601_v19 = vmul.f32 %v1527_v1, %v1527_v1  ;;  %v2492_v29 = vpop.f32.mrb[30].mxu0 }
 0x12b   : > { %v1560_v18 = vmul.f32 %v1529_v6, %v2322_v30  ;;  %v1602_v25 = vmul.f32 %v1529_v6, %v1529_v6  ;;  %v1561_v38 = vmul.f32 %v1531_v54, %v2332_v47  ;;  %v1603_v28 = vmul.f32 %v1531_v54, %v1531_v54  ;;  %v2495_v3 = vpop.f32.mrb[31].mxu0 }
 0x12c   : > { %v1291_v34 = vadd.f32 %v1290_v33, %v1267_v32  ;;  %v1333_v11 = vadd.f32 %v1332_v45, %v1309_v13  ;;  %v1572_v12 = vadd.f32 %v1571_v63, %v1559_v8  ;;  %v1614_v0 = vadd.f32 %v1613_v31, %v1601_v19 }
 0x12d   : > { %v1585_v43 = vadd.f32 %v1584_v55, %v1560_v18  ;;  %v1627_v4 = vadd.f32 %v1626_v56, %v1602_v25  ;;  %v1935_v60 = vpop.eup %1934  ;;  %v1562_v24 = vmul.f32 %v1533_v48, %v2337_v53  ;;  %v1604_v23 = vmul.f32 %v1533_v48, %v1533_v48 }
 0x12e   : > { %v1242_v30 = vadd.f32 %v2432_v59, %v2281_v17  ;;  %v1244_v9 = vadd.f32 %v2437_v37, %v2281_v17  ;;  %v1057_v47 = vmul.f32 %v1935_v60, %v2424_v42  ;;  %v1573_v22 = vadd.f32 %v1572_v12, %v1561_v38 }
 0x12f   : > { %v1937_v35 = vpop.eup %1936  ;;  %v1615_v7 = vadd.f32 %v1614_v0, %v1603_v28  ;;  %v1246_v63 = vadd.f32 %v2443_v40, %v2306_v50  ;;  %v1586_v55 = vadd.f32 %v1585_v43, %v1562_v24  ;;  %v1628_v56 = vadd.f32 %v1627_v4, %v1604_v23  ;;  %v2623_v4 = vld [vmem:[#allocation3_spill] sm:$0xff] }
 0x130   : > { %v1058_v31 = vmul.f32 %v1937_v35, %v2427_v61  ;;  %v1268_v53 = vmul.f32 %v1242_v30, %v2354_v14  ;;  %v1059_v33 = vmul.f32 0.05, %v1057_v47  ;;  %v1310_v45 = vmul.f32 %v1242_v30, %v1242_v30  ;;  %v2624_v47 = vld [vmem:[#allocation4_spill] sm:$0xff] }
 0x131   : > { %v1269_v59 = vmul.f32 %v1244_v9, %v2357_v26  ;;  %v1311_v44 = vmul.f32 %v1244_v9, %v1244_v9  ;;  %v2619_v17 = vlaneseq  ;;  %v1270_v40 = vmul.f32 %v1246_v63, %v2362_v10 }
 0x132   : > { %v1060_v42 = vmul.f32 0.05, %v1058_v31  ;;  %v1279_v1 = vadd.f32 %v1278_v36, %v1268_v53  ;;  %v1312_v6 = vmul.f32 %v1246_v63, %v1246_v63  ;;  %v1061_v61 = vadd.f32 0.05, %v1059_v33  ;;  %v2625_v53 = vld [vmem:[#allocation2_spill] sm:$0xff] }
 0x133   : > { %vm2509_vm6 = vcmp.lt.s32.totalorder %v2619_v17, 256  ;;  %v1321_v54 = vadd.f32 %v1320_v20, %v1310_v45  ;;  %v1292_v32 = vadd.f32 %v1291_v34, %v1269_v59  ;;  %v1334_v13 = vadd.f32 %v1333_v11, %v1311_v44  ;;  %v2622_v11 = vld [vmem:[#allocation5_spill] sm:$0xff]  ;;  %v2626_v45 = vld [vmem:[#allocation6_spill] sm:$0xff]  ;;  %v2627_v17 = vld [vmem:[#allocation7_spill] sm:$0xff] }
 0x134   : > { %v1062_v48 = vadd.f32 0.05, %v1060_v42  ;;  %v1280_v8 = vadd.f32 %v1279_v1, %v1270_v40  ;;  %v1248_v19 = vadd.f32 %v2449_v51, %v2306_v50  ;;  %v1537_v18 = vadd.f32 %v2445_v5, %v2279_v16  ;;  %v2628_v1 = vld [vmem:[#allocation8_spill] sm:$0xff] }
 0x135   : > { %v1322_v25 = vadd.f32 %v1321_v54, %v1312_v6  ;;  %v1539_v36 = vadd.f32 %v2451_v2, %v2279_v16  ;;  %v1541_v38 = vadd.f32 %v2458_v49, %v2287_v21  ;;  %v1543_v20 = vadd.f32 %v2461_v62, %v2287_v21  ;;  %v1431_v54 = vpop.permute.xlu1 %1430 }
 0x136   : > { %v1065_v34 = vcombine.low %v1061_v61, %v1062_v48  ;;  %v1271_v28 = vmul.f32 %v1248_v19, %v2622_v11  ;;  %v1313_v12 = vmul.f32 %v1248_v19, %v1248_v19  ;;  %v1563_v50 = vmul.f32 %v1537_v18, %v2354_v14 }
 0x137   : > { %v1605_v51 = vmul.f32 %v1537_v18, %v1537_v18  ;;  %v1564_v5 = vmul.f32 %v1539_v36, %v2357_v26  ;;  %v1606_v0 = vmul.f32 %v1539_v36, %v1539_v36  ;;  %v1565_v43 = vmul.f32 %v1541_v38, %v2362_v10  ;;  %v1142_v26 = vpop.permute.xlu0 %1141 }
 0x138   : > { %v1072_v16 = vrot.slane %v1065_v34, %v2623_v4  ;;  %v1293_v2 = vadd.f32 %v1292_v32, %v1271_v28  ;;  %v1335_v60 = vadd.f32 %v1334_v13, %v1313_v12  ;;  %v1574_v49 = vadd.f32 %v1573_v22, %v1563_v50 }
 0x139   : > { %v1616_v21 = vadd.f32 %v1615_v7, %v1605_v51  ;;  %v1587_v14 = vadd.f32 %v1586_v55, %v1564_v5  ;;  %v1629_v62 = vadd.f32 %v1628_v56, %v1606_v0  ;;  %v1607_v24 = vmul.f32 %v1541_v38, %v1541_v38 }
 0x13a   : > { %v1079_v23 = vrot.slane %v1072_v16, %v2623_v4  ;;  %v1575_v10 = vadd.f32 %v1574_v49, %v1565_v43  ;;  %v1566_v30 = vmul.f32 %v1543_v20, %v2622_v11  ;;  %v1608_v9 = vmul.f32 %v1543_v20, %v1543_v20 }
 0x13b   : > { %v1617_v35 = vadd.f32 %v1616_v21, %v1607_v24  ;;  %v1252_v22 = vadd.f32 %v2467_v41, %v2624_v47  ;;  %v1254_v63 = vadd.f32 %v2471_v52, %v2624_v47  ;;  %v1256_v31 = vadd.f32 %v2479_v58, %v1142_v26  ;;  %v2629_v58 = vld [vmem:[#allocation9_spill] sm:$0xff] }
 0x13c   : > { %v1588_v7 = vadd.f32 %v1587_v14, %v1566_v30  ;;  %v1630_v55 = vadd.f32 %v1629_v62, %v1608_v9  ;;  %1085 = vst.msk [vmem:[%s2534_s17] ss:$4 sm:$0x3] %vm2509_vm6, %v1079_v23  ;;  %v1258_v56 = vadd.f32 %v2486_v46, %v1142_v26  ;;  %v1547_v33 = vadd.f32 %v2481_v39, %v2625_v53 }
 0x13d   : > { %v1272_v59 = vmul.f32 %v1252_v22, %v2626_v45  ;;  %v1314_v44 = vmul.f32 %v1252_v22, %v1252_v22  ;;  %v1273_v41 = vmul.f32 %v1254_v63, %v2627_v17  ;;  %v1315_v42 = vmul.f32 %v1254_v63, %v1254_v63 }
 0x13e   : > { %v1274_v52 = vmul.f32 %v1256_v31, %v2628_v1  ;;  %v1316_v40 = vmul.f32 %v1256_v31, %v1256_v31  ;;  %v1275_v6 = vmul.f32 %v1258_v56, %v2629_v58  ;;  %v1317_v61 = vmul.f32 %v1258_v56, %v1258_v56 }
 0x13f   : > { %v1281_v32 = vadd.f32 %v1280_v8, %v1272_v59  ;;  %v1323_v13 = vadd.f32 %v1322_v25, %v1314_v44  ;;  %v1294_v48 = vadd.f32 %v1293_v2, %v1273_v41  ;;  %v1336_v46 = vadd.f32 %v1335_v60, %v1315_v42 }
 0x140   : > { %v1567_v19 = vmul.f32 %v1547_v33, %v2626_v45  ;;  %v1609_v39 = vmul.f32 %v1547_v33, %v1547_v33  ;;  %v1549_v18 = vadd.f32 %v2488_v57, %v2625_v53  ;;  %v1551_v36 = vadd.f32 %v2492_v29, %v1431_v54 }
 0x141   : > { %v1282_v38 = vadd.f32 %v1281_v32, %v1274_v52  ;;  %v1324_v20 = vadd.f32 %v1323_v13, %v1316_v40  ;;  %v1295_v34 = vadd.f32 %v1294_v48, %v1275_v6  ;;  %v1337_v11 = vadd.f32 %v1336_v46, %v1317_v61 }
 0x142   : > { %v1576_v28 = vadd.f32 %v1575_v10, %v1567_v19  ;;  %v1618_v12 = vadd.f32 %v1617_v35, %v1609_v39  ;;  %v1568_v50 = vmul.f32 %v1549_v18, %v2627_v17  ;;  %v1610_v8 = vmul.f32 %v1549_v18, %v1549_v18 }
 0x143   : > { %v1325_v25 = vrot.slane %v1324_v20, 4  ;;  %v1338_v51 = vrot.slane %v1337_v11, 4  ;;  %v1569_v43 = vmul.f32 %v1551_v36, %v2628_v1  ;;  %v1611_v16 = vmul.f32 %v1551_v36, %v1551_v36 }
 0x144   : > { %v1589_v5 = vadd.f32 %v1588_v7, %v1568_v50  ;;  %v1631_v0 = vadd.f32 %v1630_v55, %v1610_v8  ;;  %v1553_v49 = vadd.f32 %v2495_v3, %v1431_v54  ;;  %v1283_v21 = vrot.slane %v1282_v38, 4 }
 0x145   : > { %v1326_v2 = vadd.f32 %v1325_v25, %v1324_v20  ;;  %v1339_v57 = vadd.f32 %v1338_v51, %v1337_v11  ;;  %v1577_v60 = vadd.f32 %v1576_v28, %v1569_v43  ;;  %v1619_v29 = vadd.f32 %v1618_v12, %v1611_v16 }
 0x146   : > { %v1296_v24 = vrot.slane %v1295_v34, 4  ;;  %v1570_v23 = vmul.f32 %v1553_v49, %v2629_v58  ;;  %v1612_v10 = vmul.f32 %v1553_v49, %v1553_v49  ;;  %v1284_v7 = vadd.f32 %v1283_v21, %v1282_v38 }
 0x147   : > { %v1327_v14 = vrot.slane %v1326_v2, 2  ;;  %v1340_v62 = vrot.slane %v1339_v57, 2  ;;  %v1620_v26 = vrot.slane %v1619_v29, 4  ;;  %v1578_v45 = vrot.slane %v1577_v60, 4 }
 0x148   : > { %v1590_v47 = vadd.f32 %v1589_v5, %v1570_v23  ;;  %v1632_v22 = vadd.f32 %v1631_v0, %v1612_v10  ;;  %v1297_v55 = vadd.f32 %v1296_v24, %v1295_v34  ;;  %v1285_v42 = vrot.slane %v1284_v7, 2 }
 0x149   : > { %v1328_v30 = vadd.f32 %v1327_v14, %v1326_v2  ;;  %v1341_v9 = vadd.f32 %v1340_v62, %v1339_v57  ;;  %v1621_v35 = vadd.f32 %v1620_v26, %v1619_v29  ;;  %v1579_v61 = vadd.f32 %v1578_v45, %v1577_v60 }
 0x14a   : > { %v1633_v53 = vrot.slane %v1632_v22, 4  ;;  %v1298_v1 = vrot.slane %v1297_v55, 2  ;;  %v1591_v54 = vrot.slane %v1590_v47, 4  ;;  %v1286_v48 = vadd.f32 %v1285_v42, %v1284_v7 }
 0x14b   : > { %v1329_v63 = vrot.slane %v1328_v30, 1  ;;  %v1342_v31 = vrot.slane %v1341_v9, 1  ;;  %v1622_v56 = vrot.slane %v1621_v35, 2  ;;  %v1580_v18 = vrot.slane %v1579_v61, 2 }
 0x14c   : > { %v1634_v44 = vadd.f32 %v1633_v53, %v1632_v22  ;;  %v1299_v39 = vadd.f32 %v1298_v1, %v1297_v55  ;;  %v1592_v36 = vadd.f32 %v1591_v54, %v1590_v47  ;;  %v1287_v34 = vrot.slane %v1286_v48, 1 }
 0x14d   : > { %v1330_v3 = vadd.f32 %v1329_v63, %v1328_v30  ;;  %v1343_v33 = vadd.f32 %v1342_v31, %v1341_v9  ;;  %v1623_v59 = vadd.f32 %v1622_v56, %v1621_v35  ;;  %v1581_v12 = vadd.f32 %v1580_v18, %v1579_v61 }
 0x14e   : > { %v1635_v40 = vrot.slane %v1634_v44, 2  ;;  %v1300_v28 = vrot.slane %v1299_v39, 1  ;;  %v1593_v50 = vrot.slane %v1592_v36, 2  ;;  %v1288_v25 = vadd.f32 %v1287_v34, %v1286_v48 }
 0x14f   : > { %v1344_v17 = vmax.f32 %v1330_v3, 1e-16  ;;  %v1345_v41 = vmax.f32 %v1343_v33, 1e-16  ;;  %v1624_v52 = vrot.slane %v1623_v59, 1  ;;  %v1582_v0 = vrot.slane %v1581_v12, 1 }
 0x150   : > { %v1636_v13 = vadd.f32 %v1635_v40, %v1634_v44  ;;  %v1301_v5 = vadd.f32 %v1300_v28, %v1299_v39  ;;  %v1594_v43 = vadd.f32 %v1593_v50, %v1592_v36 }
 0x151   : > { %v1346_v58 = vmul.f32 %v1344_v17, %v2434_v27  ;;  %v1347_v6 = vmul.f32 %v1345_v41, %v2439_v15  ;;  %v1625_v32 = vadd.f32 %v1624_v52, %v1623_v59  ;;  %v1583_v29 = vadd.f32 %v1582_v0, %v1581_v12 }
 0x152   : > { %v1637_v19 = vrot.slane %v1636_v13, 1  ;;  %v1595_v49 = vrot.slane %v1594_v43, 1 }
 0x153   : > { %1938 = vrsqrt.f32 %v1346_v58  ;;  %v1639_v46 = vmax.f32 %v1625_v32, 1e-16 }
 0x154   : > { %1940 = vrsqrt.f32 %v1347_v6  ;;  %v1638_v20 = vadd.f32 %v1637_v19, %v1636_v13  ;;  %v1596_v23 = vadd.f32 %v1595_v49, %v1594_v43 }
 0x155   : > { %v1641_v38 = vmul.f32 %v1639_v46, %v2434_v27 }
 0x156   : > { %v1640_v11 = vmax.f32 %v1638_v20, 1e-16 }
 0x157   : > { %1942 = vrsqrt.f32 %v1641_v38 }
 0x158   : > { %v1642_v8 = vmul.f32 %v1640_v11, %v2439_v15 }
 0x15a   : > { %1944 = vrsqrt.f32 %v1642_v8 }
 0x15d   : > { %v1939_v51 = vpop.eup %1938 }
 0x15e   : > { %v1941_v16 = vpop.eup %1940  ;;  %v1350_v2 = vmul.f32 %v1939_v51, %v1288_v25 }
 0x15f   : > { %v1351_v57 = vmul.f32 %v1941_v16, %v1301_v5 }
 0x160   : > { %v1352_v60 = vmul.f32 0.1, %v1350_v2 }
 0x161   : > { %v1353_v27 = vmul.f32 0.1, %v1351_v57  ;;  %v1943_v21 = vpop.eup %1942 }
 0x162   : > { %v1354_v14 = vadd.f32 0.1, %v1352_v60  ;;  %v1645_v24 = vmul.f32 %v1943_v21, %v1583_v29 }
 0x163   : > { %v1355_v62 = vadd.f32 0.1, %v1353_v27 }
 0x164   : > { %v1647_v26 = vmul.f32 0.25, %v1645_v24  ;;  %v1945_v10 = vpop.eup %1944 }
 0x165   : > { %v1358_v15 = vcombine.low %v1354_v14, %v1355_v62  ;;  %v1646_v9 = vmul.f32 %v1945_v10, %v1596_v23 }
 0x166   : > { %v1649_v47 = vadd.f32 0.25, %v1647_v26 }
 0x167   : > { %v1365_v30 = vrot.slane %v1358_v15, %v2623_v4  ;;  %v1648_v22 = vmul.f32 0.25, %v1646_v9 }
 0x169   : > { %v1372_v35 = vrot.slane %v1365_v30, %v2623_v4  ;;  %v1650_v63 = vadd.f32 0.25, %v1648_v22 }
 0x16b   : > { %1860 = vst.msk [vmem:[%s2534_s17 + $0x1] ss:$4 sm:$0x3] %vm2509_vm6, %v1372_v35  ;;  %v1653_v31 = vcombine.low %v1649_v47, %v1650_v63 }
 0x16d   : > { %v1660_v7 = vrot.slane %v1653_v31, %v2623_v4 }
 0x16f   : > { %v1667_v55 = vrot.slane %v1660_v7, %v2623_v4 }
 0x171   : > { %1871 = vst.msk [vmem:[%s2534_s17 + $0x2] ss:$4 sm:$0x3] %vm2509_vm6, %v1667_v55 }
 0x172 PF: > { %s22_s23 = sadd.s32 1, %s1968_s23   ;;  %s2630_s21 = smov %s1964_s22 }
 0x173   : > { %p19_p5 = scmp.ge.s32.totalorder %s22_s23, 4   ;;  %s2631_s22 = smov %s2633_s24 }
 0x175   :  { %21 = sbr.rel (!%p19_p5) target bundleno = 2 (0x2), region = 109 }

</bundles_post_ra>
